<compile_context>
chip_gen: v6e
topology: v6e:2x2x1
jax: 0.10.0
libtpu: 0.0.40
codegen_flags: <defaults>
</compile_context>

<pallas_src>
import functools

import jax
import jax.numpy as jnp
from jax.experimental import pallas as pl
from jax.experimental.pallas import tpu as pltpu


def _overlap_patch_embed_kernel(x_ref, o_ref, *, patch_size, stride, patch_num, in_channs):
    # x_ref: (C, H, W)            -- full image for the current batch item.
    # o_ref: (patch_num, C*P*P)   -- lane-dense block for patch-row i.
    P = patch_size
    PP = P * P
    i = pl.program_id(1)
    row0 = pl.multiple_of(i * stride, stride)

    # Gather the patch_num overlapping (C, P, P) windows of this patch-row
    # strip and stack them over the patch-column axis j.
    wins = [
        x_ref[:, pl.ds(row0, P), j * stride : j * stride + P]
        for j in range(patch_num)
    ]
    ps = jnp.stack(wins, axis=0).astype(o_ref.dtype)  # (pn, C, P, P)

    # Scatter into the lane-dense output block.  Output lanes are ordered
    # (c, d1, d2); write one (pn, P) row-group per (c, d1).
    for c in range(in_channs):
        for d1 in range(P):
            off = c * PP + d1 * P
            o_ref[:, off : off + P] = ps[:, c, d1, :]


def overlap_patch_embed(x, patch_size, overlap=0, *, out_dtype=None):
    """Pallas implementation of OverlapPatchEmbed.forward.

    Returns (B, patch_num*patch_num, C, patch_size*patch_size).
    out_dtype defaults to x.dtype (don't force f32 write traffic); for f32
    inputs this matches the PyTorch reference exactly.
    """
    batch_size, in_channs, img_size, img_size_w = x.shape
    assert img_size == img_size_w, "expects square images (as the reference does)"
    stride = patch_size - overlap
    assert (img_size - patch_size) % stride == 0, "adjust the patch_size and the overlap_size!"
    patch_num = (img_size - patch_size) // stride + 1
    out_dtype = x.dtype if out_dtype is None else out_dtype

    if overlap == 0:
        # No data duplication: pure layout permutation -> let XLA do it.
        y = x.reshape(batch_size, in_channs, patch_num, patch_size, patch_num, patch_size)
        y = jnp.transpose(y, (0, 2, 4, 1, 3, 5))  # (B, pn, pn, C, P, P)
        return y.reshape(
            batch_size, patch_num * patch_num, in_channs, patch_size * patch_size
        ).astype(out_dtype)

    D = in_channs * patch_size * patch_size  # lane width of the output block (>=128 for C>=2, P=8)

    kernel = functools.partial(
        _overlap_patch_embed_kernel,
        patch_size=patch_size,
        stride=stride,
        patch_num=patch_num,
        in_channs=in_channs,
    )

    out = pl.pallas_call(
        kernel,
        out_shape=jax.ShapeDtypeStruct(
            (batch_size, patch_num, patch_num, D), out_dtype
        ),
        grid=(batch_size, patch_num),
        in_specs=[
            # Whole image per batch item; index constant in i -> only re-DMA'd
            # when b changes.
            pl.BlockSpec((None, in_channs, img_size, img_size), lambda b, i: (b, 0, 0, 0))
        ],
        out_specs=pl.BlockSpec(
            (None, None, patch_num, D), lambda b, i: (b, i, 0, 0)
        ),
        compiler_params=pltpu.CompilerParams(
            dimension_semantics=("parallel", "parallel"),
            vmem_limit_bytes=32 * 1024 * 1024,
        ),
    )(x)

    # Contiguous reshape: (B, pn, pn, C*P*P) -> (B, pn*pn, C, P*P).
    return out.reshape(
        batch_size, patch_num * patch_num, in_channs, patch_size * patch_size
    )


def _reference_overlap_patch_embed(x, patch_size, overlap=0):
    """Pure-JAX reference mirroring the PyTorch forward exactly."""
    batch_size, in_channs, img_size, _ = x.shape
    stride = patch_size - overlap
    patch_num = (img_size - patch_size) // stride + 1
    rows = []
    for i in range(patch_num):
        cols = []
        for j in range(patch_num):
            cols.append(
                x[:, :, i * stride : i * stride + patch_size, j * stride : j * stride + patch_size]
            )
        rows.append(jnp.stack(cols, axis=1))
    patches = jnp.stack(rows, axis=1)  # (B, pn, pn, C, P, P)
    return patches.reshape(
        batch_size, patch_num * patch_num, in_channs, patch_size * patch_size
    )


if __name__ == "__main__":
    key = jax.random.PRNGKey(0)
    B, C, H = 2, 4, 16
    x = jax.random.normal(key, (B, C, H, H), dtype=jnp.float32)

    # Overlapping config (exercises the Pallas kernel): patch 8, overlap 4
    # -> stride 4, patch_num 3, lane width C*P*P = 256.
    out = overlap_patch_embed(x, patch_size=8, overlap=4)
    out = jax.block_until_ready(out)
    ref = _reference_overlap_patch_embed(x, 8, 4)
    assert out.shape == ref.shape == (B, 9, C, 64), out.shape
    assert out.dtype == x.dtype
    assert jnp.allclose(out, ref), "mismatch vs reference (overlap=4)"

    # Non-overlapping config exercises the plain-JAX fast path.
    out0 = jax.block_until_ready(overlap_patch_embed(x, patch_size=8, overlap=0))
    ref0 = _reference_overlap_patch_embed(x, 8, 0)
    assert out0.shape == ref0.shape == (B, 4, C, 64), out0.shape
    assert jnp.allclose(out0, ref0), "mismatch vs reference (overlap=0)"

    print("KERNEL_OK")
</pallas_src>

<mosaic_0001>
module attributes {stable_mosaic.version = 11 : i64} {
  func.func @_overlap_patch_embed_kernel(%arg0: i32, %arg1: i32, %arg2: memref<1x4x16x16xf32, #tpu.memory_space<vmem>>, %arg3: memref<1x1x3x256xf32, #tpu.memory_space<vmem>>) attributes {dimension_semantics = [#tpu.dimension_semantics<parallel>, #tpu.dimension_semantics<parallel>], iteration_bounds = array<i64: 2, 3>, scalar_prefetch = 0 : i64, scratch_operands = 0 : i64, tpu.core_type = #tpu.core_type<tc>, window_params = [{transform_indices = @transform_0, window_bounds = array<i64: 1, 4, 16, 16>}, {transform_indices = @transform_1, window_bounds = array<i64: 1, 1, 3, 256>}]} {
    %c4_i32 = arith.constant 4 : i32
    %0 = arith.muli %arg1, %c4_i32 : i32
    %1 = tpu.assume_multiple %0, 4 : i32
    %c0 = arith.constant 0 : index
    %c0_0 = arith.constant 0 : index
    %2 = arith.index_cast %1 : i32 to index
    %c0_1 = arith.constant 0 : index
    %3 = vector.load %arg2[%c0, %c0_0, %2, %c0_1] : memref<1x4x16x16xf32, #tpu.memory_space<vmem>>, vector<1x4x8x8xf32>
    %4 = vector.shape_cast %3 : vector<1x4x8x8xf32> to vector<4x8x8xf32>
    %c0_2 = arith.constant 0 : index
    %c0_3 = arith.constant 0 : index
    %5 = arith.index_cast %1 : i32 to index
    %c4 = arith.constant 4 : index
    %6 = vector.load %arg2[%c0_2, %c0_3, %5, %c4] : memref<1x4x16x16xf32, #tpu.memory_space<vmem>>, vector<1x4x8x8xf32>
    %7 = vector.shape_cast %6 : vector<1x4x8x8xf32> to vector<4x8x8xf32>
    %c0_4 = arith.constant 0 : index
    %c0_5 = arith.constant 0 : index
    %8 = arith.index_cast %1 : i32 to index
    %c8 = arith.constant 8 : index
    %9 = vector.load %arg2[%c0_4, %c0_5, %8, %c8] : memref<1x4x16x16xf32, #tpu.memory_space<vmem>>, vector<1x4x8x8xf32>
    %10 = vector.shape_cast %9 : vector<1x4x8x8xf32> to vector<4x8x8xf32>
    %11 = vector.shape_cast %4 : vector<4x8x8xf32> to vector<1x4x8x8xf32>
    %12 = vector.shape_cast %7 : vector<4x8x8xf32> to vector<1x4x8x8xf32>
    %13 = vector.shape_cast %10 : vector<4x8x8xf32> to vector<1x4x8x8xf32>
    %14 = tpu.concatenate %11, %12, %13 in 0 : vector<1x4x8x8xf32>, vector<1x4x8x8xf32>, vector<1x4x8x8xf32> -> vector<3x4x8x8xf32>
    %15 = vector.extract_strided_slice %14 {offsets = [0, 0, 0, 0], sizes = [3, 1, 1, 8], strides = [1, 1, 1, 1]} : vector<3x4x8x8xf32> to vector<3x1x1x8xf32>
    %16 = vector.shape_cast %15 : vector<3x1x1x8xf32> to vector<3x8xf32>
    %c0_6 = arith.constant 0 : index
    %c0_7 = arith.constant 0 : index
    %c0_8 = arith.constant 0 : index
    %c0_9 = arith.constant 0 : index
    %17 = vector.load %arg3[%c0_6, %c0_7, %c0_8, %c0_9] : memref<1x1x3x256xf32, #tpu.memory_space<vmem>>, vector<1x1x3x8xf32>
    %18 = vector.shape_cast %17 : vector<1x1x3x8xf32> to vector<3x8xf32>
    %19 = vector.shape_cast %16 : vector<3x8xf32> to vector<1x1x3x8xf32>
    tpu.vector_store %arg3[%c0_6, %c0_7, %c0_8, %c0_9], %19 {strides = array<i32>} : memref<1x1x3x256xf32, #tpu.memory_space<vmem>>, vector<1x1x3x8xf32>,
    %20 = vector.extract_strided_slice %14 {offsets = [0, 0, 1, 0], sizes = [3, 1, 1, 8], strides = [1, 1, 1, 1]} : vector<3x4x8x8xf32> to vector<3x1x1x8xf32>
    %21 = vector.shape_cast %20 : vector<3x1x1x8xf32> to vector<3x8xf32>
    %c0_10 = arith.constant 0 : index
    %c0_11 = arith.constant 0 : index
    %c0_12 = arith.constant 0 : index
    %c8_13 = arith.constant 8 : index
    %22 = vector.load %arg3[%c0_10, %c0_11, %c0_12, %c8_13] : memref<1x1x3x256xf32, #tpu.memory_space<vmem>>, vector<1x1x3x8xf32>
    %23 = vector.shape_cast %22 : vector<1x1x3x8xf32> to vector<3x8xf32>
    %24 = vector.shape_cast %21 : vector<3x8xf32> to vector<1x1x3x8xf32>
    tpu.vector_store %arg3[%c0_10, %c0_11, %c0_12, %c8_13], %24 {strides = array<i32>} : memref<1x1x3x256xf32, #tpu.memory_space<vmem>>, vector<1x1x3x8xf32>,
    %25 = vector.extract_strided_slice %14 {offsets = [0, 0, 2, 0], sizes = [3, 1, 1, 8], strides = [1, 1, 1, 1]} : vector<3x4x8x8xf32> to vector<3x1x1x8xf32>
    %26 = vector.shape_cast %25 : vector<3x1x1x8xf32> to vector<3x8xf32>
    %c0_14 = arith.constant 0 : index
    %c0_15 = arith.constant 0 : index
    %c0_16 = arith.constant 0 : index
    %c16 = arith.constant 16 : index
    %27 = vector.load %arg3[%c0_14, %c0_15, %c0_16, %c16] : memref<1x1x3x256xf32, #tpu.memory_space<vmem>>, vector<1x1x3x8xf32>
    %28 = vector.shape_cast %27 : vector<1x1x3x8xf32> to vector<3x8xf32>
    %29 = vector.shape_cast %26 : vector<3x8xf32> to vector<1x1x3x8xf32>
    tpu.vector_store %arg3[%c0_14, %c0_15, %c0_16, %c16], %29 {strides = array<i32>} : memref<1x1x3x256xf32, #tpu.memory_space<vmem>>, vector<1x1x3x8xf32>,
    %30 = vector.extract_strided_slice %14 {offsets = [0, 0, 3, 0], sizes = [3, 1, 1, 8], strides = [1, 1, 1, 1]} : vector<3x4x8x8xf32> to vector<3x1x1x8xf32>
    %31 = vector.shape_cast %30 : vector<3x1x1x8xf32> to vector<3x8xf32>
    %c0_17 = arith.constant 0 : index
    %c0_18 = arith.constant 0 : index
    %c0_19 = arith.constant 0 : index
    %c24 = arith.constant 24 : index
    %32 = vector.load %arg3[%c0_17, %c0_18, %c0_19, %c24] : memref<1x1x3x256xf32, #tpu.memory_space<vmem>>, vector<1x1x3x8xf32>
    %33 = vector.shape_cast %32 : vector<1x1x3x8xf32> to vector<3x8xf32>
    %34 = vector.shape_cast %31 : vector<3x8xf32> to vector<1x1x3x8xf32>
    tpu.vector_store %arg3[%c0_17, %c0_18, %c0_19, %c24], %34 {strides = array<i32>} : memref<1x1x3x256xf32, #tpu.memory_space<vmem>>, vector<1x1x3x8xf32>,
    %35 = vector.extract_strided_slice %14 {offsets = [0, 0, 4, 0], sizes = [3, 1, 1, 8], strides = [1, 1, 1, 1]} : vector<3x4x8x8xf32> to vector<3x1x1x8xf32>
    %36 = vector.shape_cast %35 : vector<3x1x1x8xf32> to vector<3x8xf32>
    %c0_20 = arith.constant 0 : index
    %c0_21 = arith.constant 0 : index
    %c0_22 = arith.constant 0 : index
    %c32 = arith.constant 32 : index
    %37 = vector.load %arg3[%c0_20, %c0_21, %c0_22, %c32] : memref<1x1x3x256xf32, #tpu.memory_space<vmem>>, vector<1x1x3x8xf32>
    %38 = vector.shape_cast %37 : vector<1x1x3x8xf32> to vector<3x8xf32>
    %39 = vector.shape_cast %36 : vector<3x8xf32> to vector<1x1x3x8xf32>
    tpu.vector_store %arg3[%c0_20, %c0_21, %c0_22, %c32], %39 {strides = array<i32>} : memref<1x1x3x256xf32, #tpu.memory_space<vmem>>, vector<1x1x3x8xf32>,
    %40 = vector.extract_strided_slice %14 {offsets = [0, 0, 5, 0], sizes = [3, 1, 1, 8], strides = [1, 1, 1, 1]} : vector<3x4x8x8xf32> to vector<3x1x1x8xf32>
    %41 = vector.shape_cast %40 : vector<3x1x1x8xf32> to vector<3x8xf32>
    %c0_23 = arith.constant 0 : index
    %c0_24 = arith.constant 0 : index
    %c0_25 = arith.constant 0 : index
    %c40 = arith.constant 40 : index
    %42 = vector.load %arg3[%c0_23, %c0_24, %c0_25, %c40] : memref<1x1x3x256xf32, #tpu.memory_space<vmem>>, vector<1x1x3x8xf32>
    %43 = vector.shape_cast %42 : vector<1x1x3x8xf32> to vector<3x8xf32>
    %44 = vector.shape_cast %41 : vector<3x8xf32> to vector<1x1x3x8xf32>
    tpu.vector_store %arg3[%c0_23, %c0_24, %c0_25, %c40], %44 {strides = array<i32>} : memref<1x1x3x256xf32, #tpu.memory_space<vmem>>, vector<1x1x3x8xf32>,
    %45 = vector.extract_strided_slice %14 {offsets = [0, 0, 6, 0], sizes = [3, 1, 1, 8], strides = [1, 1, 1, 1]} : vector<3x4x8x8xf32> to vector<3x1x1x8xf32>
    %46 = vector.shape_cast %45 : vector<3x1x1x8xf32> to vector<3x8xf32>
    %c0_26 = arith.constant 0 : index
    %c0_27 = arith.constant 0 : index
    %c0_28 = arith.constant 0 : index
    %c48 = arith.constant 48 : index
    %47 = vector.load %arg3[%c0_26, %c0_27, %c0_28, %c48] : memref<1x1x3x256xf32, #tpu.memory_space<vmem>>, vector<1x1x3x8xf32>
    %48 = vector.shape_cast %47 : vector<1x1x3x8xf32> to vector<3x8xf32>
    %49 = vector.shape_cast %46 : vector<3x8xf32> to vector<1x1x3x8xf32>
    tpu.vector_store %arg3[%c0_26, %c0_27, %c0_28, %c48], %49 {strides = array<i32>} : memref<1x1x3x256xf32, #tpu.memory_space<vmem>>, vector<1x1x3x8xf32>,
    %50 = vector.extract_strided_slice %14 {offsets = [0, 0, 7, 0], sizes = [3, 1, 1, 8], strides = [1, 1, 1, 1]} : vector<3x4x8x8xf32> to vector<3x1x1x8xf32>
    %51 = vector.shape_cast %50 : vector<3x1x1x8xf32> to vector<3x8xf32>
    %c0_29 = arith.constant 0 : index
    %c0_30 = arith.constant 0 : index
    %c0_31 = arith.constant 0 : index
    %c56 = arith.constant 56 : index
    %52 = vector.load %arg3[%c0_29, %c0_30, %c0_31, %c56] : memref<1x1x3x256xf32, #tpu.memory_space<vmem>>, vector<1x1x3x8xf32>
    %53 = vector.shape_cast %52 : vector<1x1x3x8xf32> to vector<3x8xf32>
    %54 = vector.shape_cast %51 : vector<3x8xf32> to vector<1x1x3x8xf32>
    tpu.vector_store %arg3[%c0_29, %c0_30, %c0_31, %c56], %54 {strides = array<i32>} : memref<1x1x3x256xf32, #tpu.memory_space<vmem>>, vector<1x1x3x8xf32>,
    %55 = vector.extract_strided_slice %14 {offsets = [0, 1, 0, 0], sizes = [3, 1, 1, 8], strides = [1, 1, 1, 1]} : vector<3x4x8x8xf32> to vector<3x1x1x8xf32>
    %56 = vector.shape_cast %55 : vector<3x1x1x8xf32> to vector<3x8xf32>
    %c0_32 = arith.constant 0 : index
    %c0_33 = arith.constant 0 : index
    %c0_34 = arith.constant 0 : index
    %c64 = arith.constant 64 : index
    %57 = vector.load %arg3[%c0_32, %c0_33, %c0_34, %c64] : memref<1x1x3x256xf32, #tpu.memory_space<vmem>>, vector<1x1x3x8xf32>
    %58 = vector.shape_cast %57 : vector<1x1x3x8xf32> to vector<3x8xf32>
    %59 = vector.shape_cast %56 : vector<3x8xf32> to vector<1x1x3x8xf32>
    tpu.vector_store %arg3[%c0_32, %c0_33, %c0_34, %c64], %59 {strides = array<i32>} : memref<1x1x3x256xf32, #tpu.memory_space<vmem>>, vector<1x1x3x8xf32>,
    %60 = vector.extract_strided_slice %14 {offsets = [0, 1, 1, 0], sizes = [3, 1, 1, 8], strides = [1, 1, 1, 1]} : vector<3x4x8x8xf32> to vector<3x1x1x8xf32>
    %61 = vector.shape_cast %60 : vector<3x1x1x8xf32> to vector<3x8xf32>
    %c0_35 = arith.constant 0 : index
    %c0_36 = arith.constant 0 : index
    %c0_37 = arith.constant 0 : index
    %c72 = arith.constant 72 : index
    %62 = vector.load %arg3[%c0_35, %c0_36, %c0_37, %c72] : memref<1x1x3x256xf32, #tpu.memory_space<vmem>>, vector<1x1x3x8xf32>
    %63 = vector.shape_cast %62 : vector<1x1x3x8xf32> to vector<3x8xf32>
    %64 = vector.shape_cast %61 : vector<3x8xf32> to vector<1x1x3x8xf32>
    tpu.vector_store %arg3[%c0_35, %c0_36, %c0_37, %c72], %64 {strides = array<i32>} : memref<1x1x3x256xf32, #tpu.memory_space<vmem>>, vector<1x1x3x8xf32>,
    %65 = vector.extract_strided_slice %14 {offsets = [0, 1, 2, 0], sizes = [3, 1, 1, 8], strides = [1, 1, 1, 1]} : vector<3x4x8x8xf32> to vector<3x1x1x8xf32>
    %66 = vector.shape_cast %65 : vector<3x1x1x8xf32> to vector<3x8xf32>
    %c0_38 = arith.constant 0 : index
    %c0_39 = arith.constant 0 : index
    %c0_40 = arith.constant 0 : index
    %c80 = arith.constant 80 : index
    %67 = vector.load %arg3[%c0_38, %c0_39, %c0_40, %c80] : memref<1x1x3x256xf32, #tpu.memory_space<vmem>>, vector<1x1x3x8xf32>
    %68 = vector.shape_cast %67 : vector<1x1x3x8xf32> to vector<3x8xf32>
    %69 = vector.shape_cast %66 : vector<3x8xf32> to vector<1x1x3x8xf32>
    tpu.vector_store %arg3[%c0_38, %c0_39, %c0_40, %c80], %69 {strides = array<i32>} : memref<1x1x3x256xf32, #tpu.memory_space<vmem>>, vector<1x1x3x8xf32>,
    %70 = vector.extract_strided_slice %14 {offsets = [0, 1, 3, 0], sizes = [3, 1, 1, 8], strides = [1, 1, 1, 1]} : vector<3x4x8x8xf32> to vector<3x1x1x8xf32>
    %71 = vector.shape_cast %70 : vector<3x1x1x8xf32> to vector<3x8xf32>
    %c0_41 = arith.constant 0 : index
    %c0_42 = arith.constant 0 : index
    %c0_43 = arith.constant 0 : index
    %c88 = arith.constant 88 : index
    %72 = vector.load %arg3[%c0_41, %c0_42, %c0_43, %c88] : memref<1x1x3x256xf32, #tpu.memory_space<vmem>>, vector<1x1x3x8xf32>
    %73 = vector.shape_cast %72 : vector<1x1x3x8xf32> to vector<3x8xf32>
    %74 = vector.shape_cast %71 : vector<3x8xf32> to vector<1x1x3x8xf32>
    tpu.vector_store %arg3[%c0_41, %c0_42, %c0_43, %c88], %74 {strides = array<i32>} : memref<1x1x3x256xf32, #tpu.memory_space<vmem>>, vector<1x1x3x8xf32>,
    %75 = vector.extract_strided_slice %14 {offsets = [0, 1, 4, 0], sizes = [3, 1, 1, 8], strides = [1, 1, 1, 1]} : vector<3x4x8x8xf32> to vector<3x1x1x8xf32>
    %76 = vector.shape_cast %75 : vector<3x1x1x8xf32> to vector<3x8xf32>
    %c0_44 = arith.constant 0 : index
    %c0_45 = arith.constant 0 : index
    %c0_46 = arith.constant 0 : index
    %c96 = arith.constant 96 : index
    %77 = vector.load %arg3[%c0_44, %c0_45, %c0_46, %c96] : memref<1x1x3x256xf32, #tpu.memory_space<vmem>>, vector<1x1x3x8xf32>
    %78 = vector.shape_cast %77 : vector<1x1x3x8xf32> to vector<3x8xf32>
    %79 = vector.shape_cast %76 : vector<3x8xf32> to vector<1x1x3x8xf32>
    tpu.vector_store %arg3[%c0_44, %c0_45, %c0_46, %c96], %79 {strides = array<i32>} : memref<1x1x3x256xf32, #tpu.memory_space<vmem>>, vector<1x1x3x8xf32>,
    %80 = vector.extract_strided_slice %14 {offsets = [0, 1, 5, 0], sizes = [3, 1, 1, 8], strides = [1, 1, 1, 1]} : vector<3x4x8x8xf32> to vector<3x1x1x8xf32>
    %81 = vector.shape_cast %80 : vector<3x1x1x8xf32> to vector<3x8xf32>
    %c0_47 = arith.constant 0 : index
    %c0_48 = arith.constant 0 : index
    %c0_49 = arith.constant 0 : index
    %c104 = arith.constant 104 : index
    %82 = vector.load %arg3[%c0_47, %c0_48, %c0_49, %c104] : memref<1x1x3x256xf32, #tpu.memory_space<vmem>>, vector<1x1x3x8xf32>
    %83 = vector.shape_cast %82 : vector<1x1x3x8xf32> to vector<3x8xf32>
    %84 = vector.shape_cast %81 : vector<3x8xf32> to vector<1x1x3x8xf32>
    tpu.vector_store %arg3[%c0_47, %c0_48, %c0_49, %c104], %84 {strides = array<i32>} : memref<1x1x3x256xf32, #tpu.memory_space<vmem>>, vector<1x1x3x8xf32>,
    %85 = vector.extract_strided_slice %14 {offsets = [0, 1, 6, 0], sizes = [3, 1, 1, 8], strides = [1, 1, 1, 1]} : vector<3x4x8x8xf32> to vector<3x1x1x8xf32>
    %86 = vector.shape_cast %85 : vector<3x1x1x8xf32> to vector<3x8xf32>
    %c0_50 = arith.constant 0 : index
    %c0_51 = arith.constant 0 : index
    %c0_52 = arith.constant 0 : index
    %c112 = arith.constant 112 : index
    %87 = vector.load %arg3[%c0_50, %c0_51, %c0_52, %c112] : memref<1x1x3x256xf32, #tpu.memory_space<vmem>>, vector<1x1x3x8xf32>
    %88 = vector.shape_cast %87 : vector<1x1x3x8xf32> to vector<3x8xf32>
    %89 = vector.shape_cast %86 : vector<3x8xf32> to vector<1x1x3x8xf32>
    tpu.vector_store %arg3[%c0_50, %c0_51, %c0_52, %c112], %89 {strides = array<i32>} : memref<1x1x3x256xf32, #tpu.memory_space<vmem>>, vector<1x1x3x8xf32>,
    %90 = vector.extract_strided_slice %14 {offsets = [0, 1, 7, 0], sizes = [3, 1, 1, 8], strides = [1, 1, 1, 1]} : vector<3x4x8x8xf32> to vector<3x1x1x8xf32>
    %91 = vector.shape_cast %90 : vector<3x1x1x8xf32> to vector<3x8xf32>
    %c0_53 = arith.constant 0 : index
    %c0_54 = arith.constant 0 : index
    %c0_55 = arith.constant 0 : index
    %c120 = arith.constant 120 : index
    %92 = vector.load %arg3[%c0_53, %c0_54, %c0_55, %c120] : memref<1x1x3x256xf32, #tpu.memory_space<vmem>>, vector<1x1x3x8xf32>
    %93 = vector.shape_cast %92 : vector<1x1x3x8xf32> to vector<3x8xf32>
    %94 = vector.shape_cast %91 : vector<3x8xf32> to vector<1x1x3x8xf32>
    tpu.vector_store %arg3[%c0_53, %c0_54, %c0_55, %c120], %94 {strides = array<i32>} : memref<1x1x3x256xf32, #tpu.memory_space<vmem>>, vector<1x1x3x8xf32>,
    %95 = vector.extract_strided_slice %14 {offsets = [0, 2, 0, 0], sizes = [3, 1, 1, 8], strides = [1, 1, 1, 1]} : vector<3x4x8x8xf32> to vector<3x1x1x8xf32>
    %96 = vector.shape_cast %95 : vector<3x1x1x8xf32> to vector<3x8xf32>
    %c0_56 = arith.constant 0 : index
    %c0_57 = arith.constant 0 : index
    %c0_58 = arith.constant 0 : index
    %c128 = arith.constant 128 : index
    %97 = vector.load %arg3[%c0_56, %c0_57, %c0_58, %c128] : memref<1x1x3x256xf32, #tpu.memory_space<vmem>>, vector<1x1x3x8xf32>
    %98 = vector.shape_cast %97 : vector<1x1x3x8xf32> to vector<3x8xf32>
    %99 = vector.shape_cast %96 : vector<3x8xf32> to vector<1x1x3x8xf32>
    tpu.vector_store %arg3[%c0_56, %c0_57, %c0_58, %c128], %99 {strides = array<i32>} : memref<1x1x3x256xf32, #tpu.memory_space<vmem>>, vector<1x1x3x8xf32>,
    %100 = vector.extract_strided_slice %14 {offsets = [0, 2, 1, 0], sizes = [3, 1, 1, 8], strides = [1, 1, 1, 1]} : vector<3x4x8x8xf32> to vector<3x1x1x8xf32>
    %101 = vector.shape_cast %100 : vector<3x1x1x8xf32> to vector<3x8xf32>
    %c0_59 = arith.constant 0 : index
    %c0_60 = arith.constant 0 : index
    %c0_61 = arith.constant 0 : index
    %c136 = arith.constant 136 : index
    %102 = vector.load %arg3[%c0_59, %c0_60, %c0_61, %c136] : memref<1x1x3x256xf32, #tpu.memory_space<vmem>>, vector<1x1x3x8xf32>
    %103 = vector.shape_cast %102 : vector<1x1x3x8xf32> to vector<3x8xf32>
    %104 = vector.shape_cast %101 : vector<3x8xf32> to vector<1x1x3x8xf32>
    tpu.vector_store %arg3[%c0_59, %c0_60, %c0_61, %c136], %104 {strides = array<i32>} : memref<1x1x3x256xf32, #tpu.memory_space<vmem>>, vector<1x1x3x8xf32>,
    %105 = vector.extract_strided_slice %14 {offsets = [0, 2, 2, 0], sizes = [3, 1, 1, 8], strides = [1, 1, 1, 1]} : vector<3x4x8x8xf32> to vector<3x1x1x8xf32>
    %106 = vector.shape_cast %105 : vector<3x1x1x8xf32> to vector<3x8xf32>
    %c0_62 = arith.constant 0 : index
    %c0_63 = arith.constant 0 : index
    %c0_64 = arith.constant 0 : index
    %c144 = arith.constant 144 : index
    %107 = vector.load %arg3[%c0_62, %c0_63, %c0_64, %c144] : memref<1x1x3x256xf32, #tpu.memory_space<vmem>>, vector<1x1x3x8xf32>
    %108 = vector.shape_cast %107 : vector<1x1x3x8xf32> to vector<3x8xf32>
    %109 = vector.shape_cast %106 : vector<3x8xf32> to vector<1x1x3x8xf32>
    tpu.vector_store %arg3[%c0_62, %c0_63, %c0_64, %c144], %109 {strides = array<i32>} : memref<1x1x3x256xf32, #tpu.memory_space<vmem>>, vector<1x1x3x8xf32>,
    %110 = vector.extract_strided_slice %14 {offsets = [0, 2, 3, 0], sizes = [3, 1, 1, 8], strides = [1, 1, 1, 1]} : vector<3x4x8x8xf32> to vector<3x1x1x8xf32>
    %111 = vector.shape_cast %110 : vector<3x1x1x8xf32> to vector<3x8xf32>
    %c0_65 = arith.constant 0 : index
    %c0_66 = arith.constant 0 : index
    %c0_67 = arith.constant 0 : index
    %c152 = arith.constant 152 : index
    %112 = vector.load %arg3[%c0_65, %c0_66, %c0_67, %c152] : memref<1x1x3x256xf32, #tpu.memory_space<vmem>>, vector<1x1x3x8xf32>
    %113 = vector.shape_cast %112 : vector<1x1x3x8xf32> to vector<3x8xf32>
    %114 = vector.shape_cast %111 : vector<3x8xf32> to vector<1x1x3x8xf32>
    tpu.vector_store %arg3[%c0_65, %c0_66, %c0_67, %c152], %114 {strides = array<i32>} : memref<1x1x3x256xf32, #tpu.memory_space<vmem>>, vector<1x1x3x8xf32>,
    %115 = vector.extract_strided_slice %14 {offsets = [0, 2, 4, 0], sizes = [3, 1, 1, 8], strides = [1, 1, 1, 1]} : vector<3x4x8x8xf32> to vector<3x1x1x8xf32>
    %116 = vector.shape_cast %115 : vector<3x1x1x8xf32> to vector<3x8xf32>
    %c0_68 = arith.constant 0 : index
    %c0_69 = arith.constant 0 : index
    %c0_70 = arith.constant 0 : index
    %c160 = arith.constant 160 : index
    %117 = vector.load %arg3[%c0_68, %c0_69, %c0_70, %c160] : memref<1x1x3x256xf32, #tpu.memory_space<vmem>>, vector<1x1x3x8xf32>
    %118 = vector.shape_cast %117 : vector<1x1x3x8xf32> to vector<3x8xf32>
    %119 = vector.shape_cast %116 : vector<3x8xf32> to vector<1x1x3x8xf32>
    tpu.vector_store %arg3[%c0_68, %c0_69, %c0_70, %c160], %119 {strides = array<i32>} : memref<1x1x3x256xf32, #tpu.memory_space<vmem>>, vector<1x1x3x8xf32>,
    %120 = vector.extract_strided_slice %14 {offsets = [0, 2, 5, 0], sizes = [3, 1, 1, 8], strides = [1, 1, 1, 1]} : vector<3x4x8x8xf32> to vector<3x1x1x8xf32>
    %121 = vector.shape_cast %120 : vector<3x1x1x8xf32> to vector<3x8xf32>
    %c0_71 = arith.constant 0 : index
    %c0_72 = arith.constant 0 : index
    %c0_73 = arith.constant 0 : index
    %c168 = arith.constant 168 : index
    %122 = vector.load %arg3[%c0_71, %c0_72, %c0_73, %c168] : memref<1x1x3x256xf32, #tpu.memory_space<vmem>>, vector<1x1x3x8xf32>
    %123 = vector.shape_cast %122 : vector<1x1x3x8xf32> to vector<3x8xf32>
    %124 = vector.shape_cast %121 : vector<3x8xf32> to vector<1x1x3x8xf32>
    tpu.vector_store %arg3[%c0_71, %c0_72, %c0_73, %c168], %124 {strides = array<i32>} : memref<1x1x3x256xf32, #tpu.memory_space<vmem>>, vector<1x1x3x8xf32>,
    %125 = vector.extract_strided_slice %14 {offsets = [0, 2, 6, 0], sizes = [3, 1, 1, 8], strides = [1, 1, 1, 1]} : vector<3x4x8x8xf32> to vector<3x1x1x8xf32>
    %126 = vector.shape_cast %125 : vector<3x1x1x8xf32> to vector<3x8xf32>
    %c0_74 = arith.constant 0 : index
    %c0_75 = arith.constant 0 : index
    %c0_76 = arith.constant 0 : index
    %c176 = arith.constant 176 : index
    %127 = vector.load %arg3[%c0_74, %c0_75, %c0_76, %c176] : memref<1x1x3x256xf32, #tpu.memory_space<vmem>>, vector<1x1x3x8xf32>
    %128 = vector.shape_cast %127 : vector<1x1x3x8xf32> to vector<3x8xf32>
    %129 = vector.shape_cast %126 : vector<3x8xf32> to vector<1x1x3x8xf32>
    tpu.vector_store %arg3[%c0_74, %c0_75, %c0_76, %c176], %129 {strides = array<i32>} : memref<1x1x3x256xf32, #tpu.memory_space<vmem>>, vector<1x1x3x8xf32>,
    %130 = vector.extract_strided_slice %14 {offsets = [0, 2, 7, 0], sizes = [3, 1, 1, 8], strides = [1, 1, 1, 1]} : vector<3x4x8x8xf32> to vector<3x1x1x8xf32>
    %131 = vector.shape_cast %130 : vector<3x1x1x8xf32> to vector<3x8xf32>
    %c0_77 = arith.constant 0 : index
    %c0_78 = arith.constant 0 : index
    %c0_79 = arith.constant 0 : index
    %c184 = arith.constant 184 : index
    %132 = vector.load %arg3[%c0_77, %c0_78, %c0_79, %c184] : memref<1x1x3x256xf32, #tpu.memory_space<vmem>>, vector<1x1x3x8xf32>
    %133 = vector.shape_cast %132 : vector<1x1x3x8xf32> to vector<3x8xf32>
    %134 = vector.shape_cast %131 : vector<3x8xf32> to vector<1x1x3x8xf32>
    tpu.vector_store %arg3[%c0_77, %c0_78, %c0_79, %c184], %134 {strides = array<i32>} : memref<1x1x3x256xf32, #tpu.memory_space<vmem>>, vector<1x1x3x8xf32>,
    %135 = vector.extract_strided_slice %14 {offsets = [0, 3, 0, 0], sizes = [3, 1, 1, 8], strides = [1, 1, 1, 1]} : vector<3x4x8x8xf32> to vector<3x1x1x8xf32>
    %136 = vector.shape_cast %135 : vector<3x1x1x8xf32> to vector<3x8xf32>
    %c0_80 = arith.constant 0 : index
    %c0_81 = arith.constant 0 : index
    %c0_82 = arith.constant 0 : index
    %c192 = arith.constant 192 : index
    %137 = vector.load %arg3[%c0_80, %c0_81, %c0_82, %c192] : memref<1x1x3x256xf32, #tpu.memory_space<vmem>>, vector<1x1x3x8xf32>
    %138 = vector.shape_cast %137 : vector<1x1x3x8xf32> to vector<3x8xf32>
    %139 = vector.shape_cast %136 : vector<3x8xf32> to vector<1x1x3x8xf32>
    tpu.vector_store %arg3[%c0_80, %c0_81, %c0_82, %c192], %139 {strides = array<i32>} : memref<1x1x3x256xf32, #tpu.memory_space<vmem>>, vector<1x1x3x8xf32>,
    %140 = vector.extract_strided_slice %14 {offsets = [0, 3, 1, 0], sizes = [3, 1, 1, 8], strides = [1, 1, 1, 1]} : vector<3x4x8x8xf32> to vector<3x1x1x8xf32>
    %141 = vector.shape_cast %140 : vector<3x1x1x8xf32> to vector<3x8xf32>
    %c0_83 = arith.constant 0 : index
    %c0_84 = arith.constant 0 : index
    %c0_85 = arith.constant 0 : index
    %c200 = arith.constant 200 : index
    %142 = vector.load %arg3[%c0_83, %c0_84, %c0_85, %c200] : memref<1x1x3x256xf32, #tpu.memory_space<vmem>>, vector<1x1x3x8xf32>
    %143 = vector.shape_cast %142 : vector<1x1x3x8xf32> to vector<3x8xf32>
    %144 = vector.shape_cast %141 : vector<3x8xf32> to vector<1x1x3x8xf32>
    tpu.vector_store %arg3[%c0_83, %c0_84, %c0_85, %c200], %144 {strides = array<i32>} : memref<1x1x3x256xf32, #tpu.memory_space<vmem>>, vector<1x1x3x8xf32>,
    %145 = vector.extract_strided_slice %14 {offsets = [0, 3, 2, 0], sizes = [3, 1, 1, 8], strides = [1, 1, 1, 1]} : vector<3x4x8x8xf32> to vector<3x1x1x8xf32>
    %146 = vector.shape_cast %145 : vector<3x1x1x8xf32> to vector<3x8xf32>
    %c0_86 = arith.constant 0 : index
    %c0_87 = arith.constant 0 : index
    %c0_88 = arith.constant 0 : index
    %c208 = arith.constant 208 : index
    %147 = vector.load %arg3[%c0_86, %c0_87, %c0_88, %c208] : memref<1x1x3x256xf32, #tpu.memory_space<vmem>>, vector<1x1x3x8xf32>
    %148 = vector.shape_cast %147 : vector<1x1x3x8xf32> to vector<3x8xf32>
    %149 = vector.shape_cast %146 : vector<3x8xf32> to vector<1x1x3x8xf32>
    tpu.vector_store %arg3[%c0_86, %c0_87, %c0_88, %c208], %149 {strides = array<i32>} : memref<1x1x3x256xf32, #tpu.memory_space<vmem>>, vector<1x1x3x8xf32>,
    %150 = vector.extract_strided_slice %14 {offsets = [0, 3, 3, 0], sizes = [3, 1, 1, 8], strides = [1, 1, 1, 1]} : vector<3x4x8x8xf32> to vector<3x1x1x8xf32>
    %151 = vector.shape_cast %150 : vector<3x1x1x8xf32> to vector<3x8xf32>
    %c0_89 = arith.constant 0 : index
    %c0_90 = arith.constant 0 : index
    %c0_91 = arith.constant 0 : index
    %c216 = arith.constant 216 : index
    %152 = vector.load %arg3[%c0_89, %c0_90, %c0_91, %c216] : memref<1x1x3x256xf32, #tpu.memory_space<vmem>>, vector<1x1x3x8xf32>
    %153 = vector.shape_cast %152 : vector<1x1x3x8xf32> to vector<3x8xf32>
    %154 = vector.shape_cast %151 : vector<3x8xf32> to vector<1x1x3x8xf32>
    tpu.vector_store %arg3[%c0_89, %c0_90, %c0_91, %c216], %154 {strides = array<i32>} : memref<1x1x3x256xf32, #tpu.memory_space<vmem>>, vector<1x1x3x8xf32>,
    %155 = vector.extract_strided_slice %14 {offsets = [0, 3, 4, 0], sizes = [3, 1, 1, 8], strides = [1, 1, 1, 1]} : vector<3x4x8x8xf32> to vector<3x1x1x8xf32>
    %156 = vector.shape_cast %155 : vector<3x1x1x8xf32> to vector<3x8xf32>
    %c0_92 = arith.constant 0 : index
    %c0_93 = arith.constant 0 : index
    %c0_94 = arith.constant 0 : index
    %c224 = arith.constant 224 : index
    %157 = vector.load %arg3[%c0_92, %c0_93, %c0_94, %c224] : memref<1x1x3x256xf32, #tpu.memory_space<vmem>>, vector<1x1x3x8xf32>
    %158 = vector.shape_cast %157 : vector<1x1x3x8xf32> to vector<3x8xf32>
    %159 = vector.shape_cast %156 : vector<3x8xf32> to vector<1x1x3x8xf32>
    tpu.vector_store %arg3[%c0_92, %c0_93, %c0_94, %c224], %159 {strides = array<i32>} : memref<1x1x3x256xf32, #tpu.memory_space<vmem>>, vector<1x1x3x8xf32>,
    %160 = vector.extract_strided_slice %14 {offsets = [0, 3, 5, 0], sizes = [3, 1, 1, 8], strides = [1, 1, 1, 1]} : vector<3x4x8x8xf32> to vector<3x1x1x8xf32>
    %161 = vector.shape_cast %160 : vector<3x1x1x8xf32> to vector<3x8xf32>
    %c0_95 = arith.constant 0 : index
    %c0_96 = arith.constant 0 : index
    %c0_97 = arith.constant 0 : index
    %c232 = arith.constant 232 : index
    %162 = vector.load %arg3[%c0_95, %c0_96, %c0_97, %c232] : memref<1x1x3x256xf32, #tpu.memory_space<vmem>>, vector<1x1x3x8xf32>
    %163 = vector.shape_cast %162 : vector<1x1x3x8xf32> to vector<3x8xf32>
    %164 = vector.shape_cast %161 : vector<3x8xf32> to vector<1x1x3x8xf32>
    tpu.vector_store %arg3[%c0_95, %c0_96, %c0_97, %c232], %164 {strides = array<i32>} : memref<1x1x3x256xf32, #tpu.memory_space<vmem>>, vector<1x1x3x8xf32>,
    %165 = vector.extract_strided_slice %14 {offsets = [0, 3, 6, 0], sizes = [3, 1, 1, 8], strides = [1, 1, 1, 1]} : vector<3x4x8x8xf32> to vector<3x1x1x8xf32>
    %166 = vector.shape_cast %165 : vector<3x1x1x8xf32> to vector<3x8xf32>
    %c0_98 = arith.constant 0 : index
    %c0_99 = arith.constant 0 : index
    %c0_100 = arith.constant 0 : index
    %c240 = arith.constant 240 : index
    %167 = vector.load %arg3[%c0_98, %c0_99, %c0_100, %c240] : memref<1x1x3x256xf32, #tpu.memory_space<vmem>>, vector<1x1x3x8xf32>
    %168 = vector.shape_cast %167 : vector<1x1x3x8xf32> to vector<3x8xf32>
    %169 = vector.shape_cast %166 : vector<3x8xf32> to vector<1x1x3x8xf32>
    tpu.vector_store %arg3[%c0_98, %c0_99, %c0_100, %c240], %169 {strides = array<i32>} : memref<1x1x3x256xf32, #tpu.memory_space<vmem>>, vector<1x1x3x8xf32>,
    %170 = vector.extract_strided_slice %14 {offsets = [0, 3, 7, 0], sizes = [3, 1, 1, 8], strides = [1, 1, 1, 1]} : vector<3x4x8x8xf32> to vector<3x1x1x8xf32>
    %171 = vector.shape_cast %170 : vector<3x1x1x8xf32> to vector<3x8xf32>
    %c0_101 = arith.constant 0 : index
    %c0_102 = arith.constant 0 : index
    %c0_103 = arith.constant 0 : index
    %c248 = arith.constant 248 : index
    %172 = vector.load %arg3[%c0_101, %c0_102, %c0_103, %c248] : memref<1x1x3x256xf32, #tpu.memory_space<vmem>>, vector<1x1x3x8xf32>
    %173 = vector.shape_cast %172 : vector<1x1x3x8xf32> to vector<3x8xf32>
    %174 = vector.shape_cast %171 : vector<3x8xf32> to vector<1x1x3x8xf32>
    tpu.vector_store %arg3[%c0_101, %c0_102, %c0_103, %c248], %174 {strides = array<i32>} : memref<1x1x3x256xf32, #tpu.memory_space<vmem>>, vector<1x1x3x8xf32>,
    return
  }
  func.func @transform_0(%arg0: i32, %arg1: i32) -> (i32, i32, i32, i32) {
    %c0_i32 = arith.constant 0 : i32
    %c0_i32_0 = arith.constant 0 : i32
    %c0_i32_1 = arith.constant 0 : i32
    %c0_i32_2 = arith.constant 0 : i32
    return %arg0, %c0_i32, %c0_i32_0, %c0_i32_1 : i32, i32, i32, i32
  }
  func.func @transform_1(%arg0: i32, %arg1: i32) -> (i32, i32, i32, i32) {
    %c0_i32 = arith.constant 0 : i32
    %c0_i32_0 = arith.constant 0 : i32
    %c0_i32_1 = arith.constant 0 : i32
    return %arg0, %arg1, %c0_i32, %c0_i32_0 : i32, i32, i32, i32
  }
}

</mosaic_0001>

<bundles_post_ra>
// kernel: tpu_custom_call.1
= control target key start
LH: loop header
LB: loop body
LE: loop exit
PB: predicated region body
PF: predicated region fallthrough
CT: control target
= control target key end

     0   :  { %6 = vsyncpa [#allocation3], 0  ;;  %s1373_s0 = inlined_call_operand.hbm [shape: f32[2,4,16,16], index: 0, kind: input, shape index: {}]   ;;  %s1374_s1 = inlined_call_operand.vmem [shape: f32[2,3,3,256], index: 1, kind: output, shape index: {}]  }
   0x1   :  { %8 = vsyncpa [#allocation3 + $0x1], 0  ;;  %s875_s6 = smov 0   ;;  %s877_s7 = smov 0  }
   0x2   :  { %s879_s8 = smov 0   ;;  %s881_s9 = smov 0  }
   0x3   :  { %s883_s10 = smov 0   ;;  %s885_s11 = smov 0  }
   0x4   :  { %s887_s12 = smov 0   ;;  %s889_s13 = smov 0  }
   0x5 LB: > { %s641_s14 = sadd.s32 4294967295, %s844_s13   ;;  %s23_s15 = sadd.s32 1, %s836_s11  ;;  %s844_s13 = sphi %s889_s13, %s14_s13   ;;  %s840_s12 = sphi %s887_s12, %s1384_s12   ;;  %s836_s11 = sphi %s885_s11, %s1383_s11   ;;  %s832_s10 = sphi %s883_s10, %s1382_s10   ;;  %s828_s9 = sphi %s881_s9, %s1381_s9   ;;  %s824_s8 = sphi %s879_s8, %s1380_s8   ;;  %s820_s7 = sphi %s877_s7, %s1379_s7   ;;  %s816_s6 = sphi %s875_s6, %s1378_s6  }
   0x6   : > { %p24_p0 = scmp.ge.s32.totalorder %s23_s15, 3  ;;  %s26_s16 = sadd.s32 1, %s840_s12 }
   0x7   : > { %s33_s17 = sadd.s32 1, %s824_s8  ;;  %p40_p1 = scmp.ne.s32.totalorder %s824_s8, %s820_s7 }
   0x8   : > { %s1386_s15 = smov (%p24_p0, %s23_s15), 0  ;;  %s1388_s16 = smov (!%p24_p0, %s26_s16), %s840_s12 }
   0x9   : > { %p41_p2 = scmp.eq.s32.totalorder %s844_s13, 0  ;;  %p46_p3 = scmp.ne.s32.totalorder %s820_s7, %s816_s6 }
   0xa   : > { %p28_p4 = scmp.ge.s32.totalorder %s1388_s16, 2  ;;  %p47_p5 = scmp.eq.s32.totalorder %s641_s14, 0 }
   0xb   : > { %p924_p6 = por %p41_p2, %p40_p1  ;;  %p663_p8 = scmp.lt.s32.totalorder %s844_s13, 6 }
   0xc   : > { %s1390_s16 = smov (%p28_p4, %s1388_s16), 0  ;;  %p930_p7 = por %p47_p5, %p46_p3 }
   0xd   : > { %s30_s20 = ssub.s32 %s840_s12, %s1390_s16  ;;  %s98_s21 = sand.u32 1, %s824_s8  }
   0xe   : > { %p31_p9 = scmp.eq.s32.totalorder %s30_s20, 0  ;;  %s645_s22 = sshll.u32 %s98_s21, 6 }
   0xf   : > { %s655_s23 = sshll.u32 %s840_s12, 10  ;;  %s102_s28 = scalar_lea.vmem [#allocation2], %s645_s22 }
  0x10   : > { %s940_s24 = scalar_select %p31_p9, %s824_s8, %s33_s17  }
  0x11   : > { %s108_s27 = scalar_lea.hbm %s1373_s0, %s655_s23  ;;  %s109_s29 = sshll.u32 %s102_s28, 4  ;;  %s110_s29 = int_to_ptr.vmem [resolvable:$true] %s109_s29 }
  0x12   : > { %p947_p10 = pnand %p663_p8, %p924_p6  ;;  %s99_s2 = scalar_lea.sflag [#allocation3], %s98_s21 }
  0x13   : > { %s763_s3 = scalar_lea.vmem %s110_s29, 1024  ;;  %s846_s4 = smov [#allocation2]  }
  0x14   : > { %p752_p11 = pneg %p947_p10  ;;  %p764_p12 = scmp.ne.s32.totalorder %s110_s29, %s763_s3 }
  0x15   : > { %s768_s5 = sshll.u32 %s846_s4, 4  ;;  %s769_s5 = int_to_ptr.vmem [resolvable:$false] %s768_s5 }
  0x16   : > { %p766_p13 = pnand %p764_p12, %p752_p11  ;;  %s770_s6 = scalar_lea.vmem %s769_s5, 2048 }
  0x17   : > { %p771_p1 = scmp.lt.s32.totalorder %s110_s29, %s769_s5  ;;  %p772_p2 = scmp.lt.s32.totalorder %s770_s6, %s763_s3 }
  0x18   : > { %p767_p0 = pneg %p766_p13 }
  0x19   : > { %p773_p3 = por %p772_p2, %p771_p1 }
  0x1b   : > { %p774_p4 = pnand %p773_p3, %p767_p0 }
  0x1d   : > { %777 = shalt.err (!%p774_p4)
}
  0x1e   : > { %s847_s14 = smov 128   ;;  %s848_s17 = smov 8  }
  0x1f   : > { %662 = dma.hbm_to_vmem [thread:$0]  (!%p947_p10), %s108_s27, 1024, %s110_s29, %s99_s2, %s847_s14, %s847_s14, %s848_s17  }
  0x20   : > { %p648_p5 = scmp.ge.s32.totalorder %s844_s13, 1  ;;  %p117_p6 = scmp.lt.s32.totalorder %s844_s13, 7 }
  0x22   : > { %p118_p8 = pnand %p648_p5, %p117_p6 }
  0x23   : > { %s123_s18 = sand.u32 (!%p118_p8), 1, %s820_s7  }
  0x24   : > { %121 = sbr.rel (%p118_p8) target bundleno = 344 (0x158), region = 24  ;;  %s649_s20 = sshll.u32 (!%p118_p8), %s123_s18, 6 }
  0x25   : > { %s124_s21 = scalar_lea.sflag (!%p118_p8), [#allocation3], %s123_s18  ;;  %s127_s22 = scalar_lea.vmem (!%p118_p8), [#allocation2], %s649_s20 }
  0x29   : > { %811 = dma.done.wait (%p930_p7), %s124_s21, 1024  }
  0x2a   : > { %813 = vsyncadd (%p930_p7), %s124_s21, 4294966272  ;;  %s652_s23 = sshll.u32 %s828_s9, 2  ;;  %s849_s26 = smov 120   ;;  %vm186_vm0 = vcmask 1041409   ;;  %vm188_vm1 = vcmask 1045509   ;;  %vm191_vm2 = vcmask 1042434  }
  0x2b   : > { %s160_s25 = scalar_lea.vmem %s127_s22, %s652_s23 [#allocation2]  ;;  %s850_s27 = smov 124   ;;  %vm193_vm3 = vcmask 1046534   ;;  %vm196_vm4 = vcmask 59392   ;;  %vm207_vm5 = vcmask 124992   ;;  %vm218_vm6 = vcmask 190592  }
  0x2c   : > { %v963_v0 = vld [vmem:[%s160_s25] sm:$0xff]  ;;  %v973_v2 = vld [vmem:[%s160_s25 + $0x30] sm:$0xff]  ;;  %s851_s19 = smov 8   ;;  %s852_s28 = smov 72   ;;  %vm230_vm7 = vcmask 256192   ;;  %vm244_vm8 = vcmask 321792  }
  0x2d   : > { %177 = vrot.lane.b32.xlu1 %v963_v0, %s849_s26  ;;  %169 = vrot.lane.b32.xlu0 %v963_v0, %s850_s27  ;;  %v968_v1 = vld [vmem:[%s160_s25 + $0x20] sm:$0xff]  ;;  %v975_v3 = vld [vmem:[%s160_s25 + $0x10] sm:$0xff]  ;;  %v198_v4 = vrot.slane %v963_v0, 1  ;;  %v466_v14 = vrot.slane %v973_v2, 1  ;;  %v209_v16 = vrot.slane %v963_v0, 2  ;;  %v220_v24 = vrot.slane %v963_v0, 3 }
  0x2e   : > { %v381_v9 = vrot.slane %v968_v1, 1  ;;  %v391_v15 = vrot.slane %v968_v1, 2  ;;  %v291_v22 = vrot.slane %v975_v3, 1  ;;  %v1020_v29 = vcombine.high %v968_v1, %v968_v1  ;;  %s853_s29 = smov 16   ;;  %s854_s30 = smov 24  }
  0x2f   : > { %v1024_v30 = vcombine.high %v963_v0, %v963_v0  ;;  %v401_v33 = vrot.slane %v968_v1, 3  ;;  %p150_p7 = scmp.lt.s32.totalorder %s832_s10, 1  ;;  %p152_p9 = scmp.lt.s32.totalorder %s828_s9, 2  ;;  %vm255_vm9 = vcmask 387392   ;;  %vm266_vm10 = vcmask 452992  }
  0x30   : > { %v425_v41 = vrot.slane %v1020_v29, 1  ;;  %s855_s2 = smov 40   ;;  %s856_s3 = smov 64   ;;  %vm278_vm11 = vcmask 518592   ;;  %vm289_vm12 = vcmask 584192   ;;  %vm300_vm13 = vcmask 649792  }
  0x31   : > { %181 = vrot.lane.b32.xlu1 %v968_v1, %s849_s26  ;;  %173 = vrot.lane.b32.xlu0 %v968_v1, %s850_s27  ;;  %v246_v42 = vrot.slane %v1024_v30, 1  ;;  %s1392_s10 = smov (!%p150_p7, %s832_s10), 1  ;;  %s1394_s9 = smov (!%p152_p9, %s828_s9), 2  ;;  %vm311_vm14 = vcmask 715392   ;;  %vm323_vm15 = vcmask 780992  }
  0x32   : > { %s656_s4 = smul.u32 6, %s1392_s10  ;;  %s650_s5 = sshll.u32 %s1394_s9, 1 }
  0x33   : > { %s857_s10 = smov 80   ;;  %s858_s14 = smov 88  }
  0x34   : > { %s1198_s9 = sadd.s32 %s656_s4, %s650_s5  ;;  %s859_s21 = smov 104  }
  0x35   : > { %175 = vrot.lane.b32.xlu1 %v973_v2, %s850_s27  ;;  %171 = vrot.lane.b32.xlu0 %v975_v3, %s850_s27  ;;  %s651_s6 = sshll.u32 %s1198_s9, 2  ;;  %s860_s22 = smov 32  }
  0x36   : > { %s1234_s20 = scalar_lea.vmem %s1374_s1, %s651_s6  ;;  %s861_s23 = smov 48  }
  0x37   : > { %s862_s25 = smov 56   ;;  %s863_s27 = smov 96  }
  0x39   : > { %183 = vrot.lane.b32.xlu1 %v973_v2, %s849_s26  ;;  %179 = vrot.lane.b32.xlu0 %v975_v3, %s849_s26 }
  0x9f   : > { %v984_v5 = vpop.permute.xlu1 %177  ;;  %v986_v6 = vpop.permute.xlu0 %169 }
  0xa0   : > { %v199_v7 = vsel %vm186_vm0, %v986_v6, %v198_v4  ;;  %v201_v8 = vrot.slane %v984_v5, 7  ;;  %v210_v20 = vrot.slane %v986_v6, 1  ;;  %v221_v28 = vrot.slane %v986_v6, 2 }
  0xa1   : > { %v200_v10 = vsel %vm188_vm1, %v986_v6, %v199_v7  ;;  %v1057_v51 = vcombine.high %v984_v5, %v984_v5  ;;  %v1061_v52 = vcombine.high %v986_v6, %v986_v6  ;;  %v224_v63 = vrot.slane %v984_v5, 1 }
  0xa2   : > { %v202_v13 = vsel %vm191_vm2, %v201_v8, %v200_v10  ;;  %v211_v32 = vsel %vm186_vm0, %v210_v20, %v209_v16  ;;  %v222_v40 = vsel %vm186_vm0, %v221_v28, %v220_v24  ;;  %v1103_v24 = vcombine.high %v973_v2, %v973_v2 }
  0xa3   : > { %v994_v11 = vpop.permute.xlu1 %181  ;;  %v996_v12 = vpop.permute.xlu0 %173  ;;  %v203_v17 = vsel %vm193_vm3, %v201_v8, %v202_v13  ;;  %v212_v46 = vsel %vm188_vm1, %v210_v20, %v211_v32  ;;  %v223_v61 = vsel %vm188_vm1, %v221_v28, %v222_v40  ;;  %v247_v8 = vsel %vm186_vm0, %v1061_v52, %v246_v42 }
  0xa4   : > { %v382_v18 = vsel %vm186_vm0, %v996_v12, %v381_v9  ;;  %v384_v19 = vrot.slane %v994_v11, 7  ;;  %204 = vrot.lane.b32.xlu0 %v203_v17, %s851_s19  ;;  %v392_v23 = vrot.slane %v996_v12, 1  ;;  %v402_v34 = vrot.slane %v996_v12, 2 }
  0xa5   : > { %v383_v21 = vsel %vm188_vm1, %v996_v12, %v382_v18  ;;  %v1044_v43 = vcombine.high %v996_v12, %v996_v12  ;;  %v1067_v55 = vcombine.high %v994_v11, %v994_v11  ;;  %v213_v58 = vsel %vm191_vm2, %v984_v5, %v212_v46 }
  0xa6   : > { %v385_v27 = vsel %vm191_vm2, %v384_v19, %v383_v21  ;;  %v393_v37 = vsel %vm186_vm0, %v392_v23, %v391_v15  ;;  %v403_v50 = vsel %vm186_vm0, %v402_v34, %v401_v33  ;;  %v405_v62 = vrot.slane %v994_v11, 1 }
  0xa7   : > { %v1012_v25 = vpop.permute.xlu1 %175  ;;  %v1014_v26 = vpop.permute.xlu0 %171  ;;  %v386_v31 = vsel %vm193_vm3, %v384_v19, %v385_v27  ;;  %v394_v49 = vsel %vm188_vm1, %v392_v23, %v393_v37  ;;  %v404_v60 = vsel %vm188_vm1, %v402_v34, %v403_v50  ;;  %v426_v4 = vsel %vm186_vm0, %v1044_v43, %v425_v41 }
  0xa8   : > { %387 = vrot.lane.b32.xlu1 %v386_v31, %s851_s19  ;;  %v467_v35 = vsel %vm186_vm0, %v1012_v25, %v466_v14  ;;  %v292_v36 = vsel %vm186_vm0, %v1014_v26, %v291_v22  ;;  %v395_v59 = vsel %vm191_vm2, %v994_v11, %v394_v49  ;;  %v214_v7 = vsel %vm193_vm3, %v984_v5, %v213_v58  ;;  %s864_s19 = smov 112  }
  0xa9   : > { %v468_v47 = vsel %vm188_vm1, %v1012_v25, %v467_v35  ;;  %v293_v48 = vsel %vm188_vm1, %v1014_v26, %v292_v36  ;;  %v396_v9 = vsel %vm193_vm3, %v994_v11, %v395_v59  ;;  %v406_v10 = vsel %vm191_vm2, %v405_v62, %v404_v60 }
  0xaa   : > { %v225_v13 = vsel %vm191_vm2, %v224_v63, %v223_v61  ;;  %v428_v14 = vrot.slane %v1067_v55, 7  ;;  %v427_v15 = vsel %vm188_vm1, %v1044_v43, %v426_v4  ;;  %v249_v16 = vrot.slane %v1057_v51, 7 }
  0xab   : > { %v1035_v38 = vpop.permute.xlu1 %183  ;;  %v1037_v39 = vpop.permute.xlu0 %179  ;;  %v456_v17 = vrot.slane %v1012_v25, 7  ;;  %v280_v18 = vrot.slane %v1014_v26, 7  ;;  %v248_v19 = vsel %vm188_vm1, %v1061_v52, %v247_v8  ;;  %v476_v20 = vrot.slane %v973_v2, 2 }
  0xac   : > { %v469_v44 = vrot.slane %v1035_v38, 7  ;;  %v294_v45 = vrot.slane %v1037_v39, 7  ;;  %v477_v21 = vrot.slane %v1012_v25, 1  ;;  %v302_v22 = vrot.slane %v975_v3, 2 }
  0xad   : > { %v303_v23 = vrot.slane %v1014_v26, 1  ;;  %v407_v27 = vsel %vm193_vm3, %v405_v62, %v406_v10  ;;  %v226_v28 = vsel %vm193_vm3, %v224_v63, %v225_v13  ;;  %v429_v31 = vsel %vm191_vm2, %v428_v14, %v427_v15 }
  0xae   : > { %v470_v53 = vsel %vm191_vm2, %v469_v44, %v468_v47  ;;  %v295_v54 = vsel %vm191_vm2, %v294_v45, %v293_v48  ;;  %v459_v32 = vrot.slane %v1035_v38, 6  ;;  %v250_v33 = vsel %vm191_vm2, %v249_v16, %v248_v19 }
  0xaf   : > { %v471_v56 = vsel %vm193_vm3, %v469_v44, %v470_v53  ;;  %v296_v57 = vsel %vm193_vm3, %v294_v45, %v295_v54  ;;  %v457_v34 = vsel %vm186_vm0, %v456_v17, %v973_v2  ;;  %v281_v35 = vsel %vm186_vm0, %v280_v18, %v975_v3 }
  0xb0   : > { %472 = vrot.lane.b32.xlu1 %v471_v56, %s852_s28  ;;  %297 = vrot.lane.b32.xlu0 %v296_v57, %s852_s28  ;;  %v283_v36 = vrot.slane %v1037_v39, 6  ;;  %v478_v37 = vsel %vm186_vm0, %v477_v21, %v476_v20  ;;  %v486_v40 = vrot.slane %v973_v2, 3  ;;  %v1120_v41 = vcombine.high %v975_v3, %v975_v3 }
  0xb1   : > { %v430_v42 = vsel %vm193_vm3, %v428_v14, %v429_v31  ;;  %v304_v44 = vsel %vm186_vm0, %v303_v23, %v302_v22  ;;  %v313_v45 = vrot.slane %v975_v3, 3  ;;  %v510_v46 = vrot.slane %v1103_v24, 1 }
  0xb2   : > { %v251_v47 = vsel %vm193_vm3, %v249_v16, %v250_v33  ;;  %v458_v2 = vsel %vm188_vm1, %v456_v17, %v457_v34  ;;  %v282_v48 = vsel %vm188_vm1, %v280_v18, %v281_v35  ;;  %v487_v49 = vrot.slane %v1012_v25, 2 }
  0xb3   : > { %v460_v50 = vsel %vm191_vm2, %v459_v32, %v458_v2  ;;  %v284_v53 = vsel %vm191_vm2, %v283_v36, %v282_v48  ;;  %v479_v3 = vsel %vm188_vm1, %v477_v21, %v478_v37  ;;  %v314_v54 = vrot.slane %v1014_v26, 2 }
  0xb4   : > { %397 = vrot.lane.b32.xlu1 %v396_v9, %s853_s29  ;;  %215 = vrot.lane.b32.xlu0 %v214_v7, %s853_s29  ;;  %v185_v56 = vrot.slane %v986_v6, 7  ;;  %v305_v57 = vsel %vm188_vm1, %v303_v23, %v304_v44  ;;  %v339_v58 = vrot.slane %v1120_v41, 1  ;;  %v257_v59 = vrot.slane %v1024_v30, 2 }
  0xb5   : > { %v1151_v60 = vcombine.high %v1012_v25, %v1012_v25  ;;  %v1155_v61 = vcombine.high %v1014_v26, %v1014_v26  ;;  %v1159_v6 = vcombine.high %v1035_v38, %v1035_v38  ;;  %v490_v62 = vrot.slane %v1035_v38, 1 }
  0xb6   : > { %v461_v63 = vsel %vm193_vm3, %v459_v32, %v460_v50  ;;  %v285_v4 = vsel %vm193_vm3, %v283_v36, %v284_v53  ;;  %v480_v7 = vsel %vm191_vm2, %v1035_v38, %v479_v3  ;;  %v488_v25 = vsel %vm186_vm0, %v487_v49, %v486_v40 }
  0xb7   : > { %v1169_v26 = vcombine.high %v1037_v39, %v1037_v39  ;;  %v306_v8 = vsel %vm191_vm2, %v1037_v39, %v305_v57  ;;  %v315_v9 = vsel %vm186_vm0, %v314_v54, %v313_v45  ;;  %v317_v10 = vrot.slane %v1037_v39, 1 }
  0xb8   : > { %408 = vrot.lane.b32.xlu1 %v407_v27, %s854_s30  ;;  %227 = vrot.lane.b32.xlu0 %v226_v28, %s854_s30  ;;  %v187_v13 = vsel %vm186_vm0, %v185_v56, %v963_v0  ;;  %v373_v14 = vrot.slane %v996_v12, 7  ;;  %v435_v15 = vrot.slane %v1020_v29, 2  ;;  %v268_v16 = vrot.slane %v1024_v30, 3 }
  0xb9   : > { %v481_v17 = vsel %vm193_vm3, %v1035_v38, %v480_v7  ;;  %v489_v18 = vsel %vm188_vm1, %v487_v49, %v488_v25  ;;  %v415_v19 = vrot.slane %v1044_v43, 7  ;;  %v235_v20 = vrot.slane %v1061_v52, 7 }
  0xba   : > { %v307_v21 = vsel %vm193_vm3, %v1037_v39, %v306_v8  ;;  %v491_v0 = vsel %vm191_vm2, %v490_v62, %v489_v18  ;;  %v316_v12 = vsel %vm188_vm1, %v314_v54, %v315_v9  ;;  %v513_v22 = vrot.slane %v1159_v6, 7 }
  0xbb   : > { %v318_v38 = vsel %vm191_vm2, %v317_v10, %v316_v12  ;;  %v511_v23 = vsel %vm186_vm0, %v1151_v60, %v510_v46  ;;  %v340_v27 = vsel %vm186_vm0, %v1155_v61, %v339_v58  ;;  %v342_v28 = vrot.slane %v1169_v26, 7 }
  0xbc   : > { %431 = vrot.lane.b32.xlu1 %v430_v42, %s855_s2  ;;  %252 = vrot.lane.b32.xlu0 %v251_v47, %s855_s2  ;;  %v189_v39 = vsel %vm188_vm1, %v185_v56, %v187_v13  ;;  %v374_v31 = vsel %vm186_vm0, %v373_v14, %v968_v1  ;;  %v445_v32 = vrot.slane %v1020_v29, 3  ;;  %v416_v33 = vsel %vm186_vm0, %v415_v19, %v1020_v29 }
  0xbd   : > { %v236_v34 = vsel %vm186_vm0, %v235_v20, %v1024_v30  ;;  %v436_v35 = vrot.slane %v1044_v43, 1  ;;  %v258_v36 = vrot.slane %v1061_v52, 1  ;;  %v492_v37 = vsel %vm193_vm3, %v490_v62, %v491_v0 }
  0xbe   : > { %v319_v40 = vsel %vm193_vm3, %v317_v10, %v318_v38  ;;  %v512_v1 = vsel %vm188_vm1, %v1151_v60, %v511_v23  ;;  %v341_v42 = vsel %vm188_vm1, %v1155_v61, %v340_v27  ;;  %v190_v29 = vrot.slane %v984_v5, 6 }
  0xbf   : > { %v375_v44 = vsel %vm188_vm1, %v373_v14, %v374_v31  ;;  %v514_v45 = vsel %vm191_vm2, %v513_v22, %v512_v1  ;;  %v343_v46 = vsel %vm191_vm2, %v342_v28, %v341_v42  ;;  %v417_v47 = vsel %vm188_vm1, %v415_v19, %v416_v33 }
  0xc0   : > { %462 = vrot.lane.b32.xlu1 %v461_v63, %s856_s3  ;;  %286 = vrot.lane.b32.xlu0 %v285_v4, %s856_s3  ;;  %v418_v2 = vrot.slane %v1067_v55, 6  ;;  %v237_v48 = vsel %vm188_vm1, %v235_v20, %v236_v34  ;;  %v238_v49 = vrot.slane %v1057_v51, 6  ;;  %v437_v50 = vsel %vm186_vm0, %v436_v35, %v435_v15 }
  0xc1   : > { %v259_v5 = vsel %vm186_vm0, %v258_v36, %v257_v59  ;;  %v446_v53 = vrot.slane %v1044_v43, 2  ;;  %v269_v3 = vrot.slane %v1061_v52, 2  ;;  %v376_v54 = vrot.slane %v994_v11, 6 }
  0xc2   : > { %v515_v56 = vsel %vm193_vm3, %v513_v22, %v514_v45  ;;  %v344_v57 = vsel %vm193_vm3, %v342_v28, %v343_v46  ;;  %v192_v58 = vsel %vm191_vm2, %v190_v29, %v189_v39  ;;  %v419_v43 = vsel %vm191_vm2, %v418_v2, %v417_v47 }
  0xc3   : > { %v239_v52 = vsel %vm191_vm2, %v238_v49, %v237_v48  ;;  %v194_v59 = vsel %vm193_vm3, %v190_v29, %v192_v58  ;;  %v438_v62 = vsel %vm188_vm1, %v436_v35, %v437_v50  ;;  %v260_v11 = vsel %vm188_vm1, %v258_v36, %v259_v5 }
  0xc4   : > { %482 = vrot.lane.b32.xlu1 %v481_v17, %s857_s10  ;;  %308 = vrot.lane.b32.xlu0 %v307_v21, %s857_s10  ;;  %197 = vst.msk [vmem:[%s1234_s20] sm:$0x7] %vm196_vm4, %v194_v59  ;;  %v377_v63 = vsel %vm191_vm2, %v376_v54, %v375_v44  ;;  %v447_v4 = vsel %vm186_vm0, %v446_v53, %v445_v32  ;;  %v500_v10 = vrot.slane %v1151_v60, 7  ;;  %v328_v14 = vrot.slane %v1155_v61, 7 }
  0xc5   : > { %v270_v7 = vsel %vm186_vm0, %v269_v3, %v268_v16  ;;  %v378_v25 = vsel %vm193_vm3, %v376_v54, %v377_v63  ;;  %v420_v8 = vsel %vm193_vm3, %v418_v2, %v419_v43  ;;  %v240_v9 = vsel %vm193_vm3, %v238_v49, %v239_v52 }
  0xc6   : > { %380 = vst.msk [vmem:[%s1234_s20 + $0x4] sm:$0x7] %vm196_vm4, %v378_v25  ;;  %v439_v13 = vsel %vm191_vm2, %v1067_v55, %v438_v62  ;;  %v261_v30 = vsel %vm191_vm2, %v1057_v51, %v260_v11  ;;  %v448_v15 = vsel %vm188_vm1, %v446_v53, %v447_v4  ;;  %v271_v16 = vsel %vm188_vm1, %v269_v3, %v270_v7 }
  0xc7   : > { %v520_v17 = vrot.slane %v1103_v24, 2  ;;  %v521_v18 = vrot.slane %v1151_v60, 1  ;;  %v449_v19 = vrot.slane %v1067_v55, 1  ;;  %v272_v20 = vrot.slane %v1057_v51, 1 }
  0xc8   : > { %493 = vrot.lane.b32.xlu1 %v492_v37, %s858_s14  ;;  %320 = vrot.lane.b32.xlu0 %v319_v40, %s858_s14  ;;  %v350_v21 = vrot.slane %v1120_v41, 2  ;;  %v351_v0 = vrot.slane %v1155_v61, 1  ;;  %v440_v12 = vsel %vm193_vm3, %v1067_v55, %v439_v13  ;;  %v262_v22 = vsel %vm193_vm3, %v1057_v51, %v261_v30 }
  0xc9   : > { %v501_v38 = vsel %vm186_vm0, %v500_v10, %v1103_v24  ;;  %v503_v23 = vrot.slane %v1159_v6, 6  ;;  %v450_v27 = vsel %vm191_vm2, %v449_v19, %v448_v15  ;;  %v273_v28 = vsel %vm191_vm2, %v272_v20, %v271_v16 }
  0xca   : > { %v329_v39 = vsel %vm186_vm0, %v328_v14, %v1120_v41  ;;  %v331_v55 = vrot.slane %v1169_v26, 6  ;;  %v522_v31 = vsel %vm186_vm0, %v521_v18, %v520_v17  ;;  %v502_v51 = vsel %vm188_vm1, %v500_v10, %v501_v38 }
  0xcb   : > { %v352_v32 = vsel %vm186_vm0, %v351_v0, %v350_v21  ;;  %v530_v33 = vrot.slane %v1103_v24, 3  ;;  %v361_v34 = vrot.slane %v1120_v41, 3  ;;  %v451_v35 = vsel %vm193_vm3, %v449_v19, %v450_v27 }
  0xcc   : > { %516 = vrot.lane.b32.xlu1 %v515_v56, %s859_s21  ;;  %345 = vrot.lane.b32.xlu0 %v344_v57, %s859_s21  ;;  %v274_v36 = vsel %vm193_vm3, %v272_v20, %v273_v28  ;;  %v504_v37 = vsel %vm191_vm2, %v503_v23, %v502_v51  ;;  %v330_v40 = vsel %vm188_vm1, %v328_v14, %v329_v39  ;;  %v531_v29 = vrot.slane %v1151_v60, 2 }
  0xcd   : > { %v332_v1 = vsel %vm191_vm2, %v331_v55, %v330_v40  ;;  %v523_v42 = vsel %vm188_vm1, %v521_v18, %v522_v31  ;;  %v362_v24 = vrot.slane %v1155_v61, 2  ;;  %v353_v41 = vsel %vm188_vm1, %v351_v0, %v352_v32 }
  0xce   : > { %v505_v44 = vsel %vm193_vm3, %v503_v23, %v504_v37  ;;  %v333_v45 = vsel %vm193_vm3, %v331_v55, %v332_v1  ;;  %v524_v46 = vsel %vm191_vm2, %v1159_v6, %v523_v42  ;;  %v534_v47 = vrot.slane %v1159_v6, 1 }
  0xcf   : > { %v354_v2 = vsel %vm191_vm2, %v1169_v26, %v353_v41  ;;  %v532_v60 = vsel %vm186_vm0, %v531_v29, %v530_v33  ;;  %v363_v61 = vsel %vm186_vm0, %v362_v24, %v361_v34  ;;  %v365_v48 = vrot.slane %v1169_v26, 1 }
  0xd0   : > { %421 = vrot.lane.b32.xlu1 %v420_v8, %s860_s22  ;;  %241 = vrot.lane.b32.xlu0 %v240_v9, %s860_s22  ;;  %v525_v49 = vsel %vm193_vm3, %v1159_v6, %v524_v46  ;;  %v355_v50 = vsel %vm193_vm3, %v1169_v26, %v354_v2  ;;  %v533_v5 = vsel %vm188_vm1, %v531_v29, %v532_v60  ;;  %vm337_vm0 = vcmask 846592  }
  0xd1   : > { %v364_v53 = vsel %vm188_vm1, %v362_v24, %v363_v61  ;;  %v535_v3 = vsel %vm191_vm2, %v534_v47, %v533_v5  ;;  %vm348_vm1 = vcmask 912192  }
  0xd2   : > { %v366_v54 = vsel %vm191_vm2, %v365_v48, %v364_v53  ;;  %v536_v56 = vsel %vm193_vm3, %v534_v47, %v535_v3  ;;  %vm359_vm2 = vcmask 977792  }
  0xd3   : > { %v367_v6 = vsel %vm193_vm3, %v365_v48, %v366_v54  ;;  %vm371_vm3 = vcmask 1043392  }
  0xd4   : > { %441 = vrot.lane.b32.xlu1 %v440_v12, %s861_s23  ;;  %263 = vrot.lane.b32.xlu0 %v262_v22, %s861_s23 }
  0xd8   : > { %452 = vrot.lane.b32.xlu1 %v451_v35, %s862_s25  ;;  %275 = vrot.lane.b32.xlu0 %v274_v36, %s862_s25 }
  0xdc   : > { %506 = vrot.lane.b32.xlu1 %v505_v44, %s863_s27  ;;  %334 = vrot.lane.b32.xlu0 %v333_v45, %s863_s27 }
  0xe0   : > { %526 = vrot.lane.b32.xlu1 %v525_v49, %s864_s19  ;;  %356 = vrot.lane.b32.xlu0 %v355_v50, %s864_s19 }
  0xe4   : > { %537 = vrot.lane.b32.xlu1 %v536_v56, %s849_s26  ;;  %368 = vrot.lane.b32.xlu0 %v367_v6, %s849_s26 }
 0x116   : > { %v205_v26 = vpop.permute.xlu0 %204 }
 0x117   : > { %208 = vst.msk [vmem:[%s1234_s20] sm:$0x7] %vm207_vm5, %v205_v26 }
 0x11a   : > { %v388_v57 = vpop.permute.xlu1 %387 }
 0x11b   : > { %390 = vst.msk [vmem:[%s1234_s20 + $0x4] sm:$0x7] %vm207_vm5, %v388_v57 }
 0x122   : > { %v473_v58 = vpop.permute.xlu1 %472  ;;  %v298_v43 = vpop.permute.xlu0 %297 }
 0x126   : > { %v398_v52 = vpop.permute.xlu1 %397  ;;  %v216_v59 = vpop.permute.xlu0 %215 }
 0x127   : > { %400 = vst.msk [vmem:[%s1234_s20 + $0x4] sm:$0x7] %vm218_vm6, %v398_v52  ;;  %219 = vst.msk [vmem:[%s1234_s20] sm:$0x7] %vm218_vm6, %v216_v59 }
 0x12a   : > { %v409_v62 = vpop.permute.xlu1 %408  ;;  %v228_v11 = vpop.permute.xlu0 %227 }
 0x12b   : > { %411 = vst.msk [vmem:[%s1234_s20 + $0x4] sm:$0x7] %vm230_vm7, %v409_v62  ;;  %231 = vst.msk [vmem:[%s1234_s20] sm:$0x7] %vm230_vm7, %v228_v11 }
 0x12e   : > { %v432_v63 = vpop.permute.xlu1 %431  ;;  %v253_v4 = vpop.permute.xlu0 %252 }
 0x132   : > { %v463_v7 = vpop.permute.xlu1 %462  ;;  %v287_v25 = vpop.permute.xlu0 %286 }
 0x136   : > { %v483_v8 = vpop.permute.xlu1 %482  ;;  %v309_v9 = vpop.permute.xlu0 %308 }
 0x13a   : > { %v494_v10 = vpop.permute.xlu1 %493  ;;  %v321_v13 = vpop.permute.xlu0 %320 }
 0x13e   : > { %v517_v30 = vpop.permute.xlu1 %516  ;;  %v346_v14 = vpop.permute.xlu0 %345 }
 0x142   : > { %v422_v15 = vpop.permute.xlu1 %421  ;;  %v242_v16 = vpop.permute.xlu0 %241 }
 0x143   : > { %424 = vst.msk [vmem:[%s1234_s20 + $0x4] sm:$0x7] %vm244_vm8, %v422_v15  ;;  %245 = vst.msk [vmem:[%s1234_s20] sm:$0x7] %vm244_vm8, %v242_v16 }
 0x144   : > { %434 = vst.msk [vmem:[%s1234_s20 + $0x4] sm:$0x7] %vm255_vm9, %v432_v63  ;;  %256 = vst.msk [vmem:[%s1234_s20] sm:$0x7] %vm255_vm9, %v253_v4 }
 0x146   : > { %v442_v17 = vpop.permute.xlu1 %441  ;;  %v264_v18 = vpop.permute.xlu0 %263 }
 0x147   : > { %444 = vst.msk [vmem:[%s1234_s20 + $0x4] sm:$0x7] %vm266_vm10, %v442_v17  ;;  %267 = vst.msk [vmem:[%s1234_s20] sm:$0x7] %vm266_vm10, %v264_v18 }
 0x14a   : > { %v453_v19 = vpop.permute.xlu1 %452  ;;  %v276_v20 = vpop.permute.xlu0 %275 }
 0x14b   : > { %455 = vst.msk [vmem:[%s1234_s20 + $0x4] sm:$0x7] %vm278_vm11, %v453_v19  ;;  %279 = vst.msk [vmem:[%s1234_s20] sm:$0x7] %vm278_vm11, %v276_v20 }
 0x14c   : > { %465 = vst.msk [vmem:[%s1234_s20 + $0x4] sm:$0x7] %vm289_vm12, %v463_v7  ;;  %290 = vst.msk [vmem:[%s1234_s20] sm:$0x7] %vm289_vm12, %v287_v25 }
 0x14d   : > { %475 = vst.msk [vmem:[%s1234_s20 + $0x4] sm:$0x7] %vm300_vm13, %v473_v58  ;;  %301 = vst.msk [vmem:[%s1234_s20] sm:$0x7] %vm300_vm13, %v298_v43 }
 0x14e   : > { %v507_v21 = vpop.permute.xlu1 %506  ;;  %485 = vst.msk [vmem:[%s1234_s20 + $0x4] sm:$0x7] %vm311_vm14, %v483_v8  ;;  %312 = vst.msk [vmem:[%s1234_s20] sm:$0x7] %vm311_vm14, %v309_v9  ;;  %v335_v0 = vpop.permute.xlu0 %334 }
 0x14f   : > { %496 = vst.msk [vmem:[%s1234_s20 + $0x4] sm:$0x7] %vm323_vm15, %v494_v10  ;;  %324 = vst.msk [vmem:[%s1234_s20] sm:$0x7] %vm323_vm15, %v321_v13 }
 0x150   : > { %509 = vst.msk [vmem:[%s1234_s20 + $0x4] sm:$0x7] %vm337_vm0, %v507_v21  ;;  %338 = vst.msk [vmem:[%s1234_s20] sm:$0x7] %vm337_vm0, %v335_v0 }
 0x151   : > { %519 = vst.msk [vmem:[%s1234_s20 + $0x4] sm:$0x7] %vm348_vm1, %v517_v30  ;;  %349 = vst.msk [vmem:[%s1234_s20] sm:$0x7] %vm348_vm1, %v346_v14 }
 0x152   : > { %v527_v12 = vpop.permute.xlu1 %526  ;;  %v357_v22 = vpop.permute.xlu0 %356 }
 0x153   : > { %529 = vst.msk [vmem:[%s1234_s20 + $0x4] sm:$0x7] %vm359_vm2, %v527_v12  ;;  %360 = vst.msk [vmem:[%s1234_s20] sm:$0x7] %vm359_vm2, %v357_v22 }
 0x156   : > { %v538_v38 = vpop.permute.xlu1 %537  ;;  %v369_v23 = vpop.permute.xlu0 %368 }
 0x157   : > { %540 = vst.msk [vmem:[%s1234_s20 + $0x4] sm:$0x7] %vm371_vm3, %v538_v38  ;;  %372 = vst.msk [vmem:[%s1234_s20] sm:$0x7] %vm371_vm3, %v369_v23 }
 0x158 PF: > { %s14_s13 = sadd.s32 1, %s844_s13   ;;  %s1378_s6 = smov %s820_s7 }
 0x159   : > { %p11_p10 = scmp.ge.s32.totalorder %s14_s13, 8   ;;  %s1379_s7 = smov %s824_s8 }
 0x15a   : > { %s1380_s8 = smov %s940_s24  ;;  %s1381_s9 = smov %s836_s11 }
 0x15b   : > { %s1382_s10 = smov %s840_s12  ;;  %s1383_s11 = smov %s1386_s15 }
 0x15c   : > { %s1384_s12 = smov %s1390_s16  ;;  %13 = sbr.rel (!%p11_p10) target bundleno = 5 (0x5), region = 65 }
 0x161   :  { %570 = vsyncpa [#allocation3], 1 }
 0x162   :  { %572 = vsyncpa [#allocation3 + $0x1], 1 }

</bundles_post_ra>
